<compile_context>
chip_gen: v6e
topology: v6e:2x2x1
jax: 0.10.0
libtpu: 0.0.40
codegen_flags: <defaults>
</compile_context>

<pallas_src>
import functools

import jax
import jax.numpy as jnp
from jax.experimental import pallas as pl
from jax.experimental.pallas import tpu as pltpu

BN_EPS = 1e-5
LANES = 128


def _round_up(a, b):
    return (a + b - 1) // b * b


def _att_learner_kernel(x_ref, scale_ref, shift_ref, o_ref, *, num_layers):
    """Fused (scale * x + shift) [+ ReLU] stack for one node tile."""
    x = x_ref[...]                                  # (TILE, Dp) f32
    for i in range(num_layers):                     # static unroll (small num_gc_layers)
        x = x * scale_ref[i] + shift_ref[i]         # one FMA per layer
        if i < num_layers - 1:
            x = jnp.maximum(x, 0.0)                 # ReLU on all but the last layer
    o_ref[...] = x.astype(o_ref.dtype)


def att_learner_forward(x, edge_index, w, gamma, beta, running_mean, running_var,
                        *, drop_ratio=0.5, tile_rows=1024):
    """x: (N, D) float32; params: (L, D) each.  edge_index unused (kept for parity)."""
    del edge_index, drop_ratio  # unused in eval-mode forward
    N, D = x.shape
    L = w.shape[0]

    # --- Fold Attentive scale + BatchNorm1d(eval) into per-layer scale/shift. ---
    inv = jax.lax.rsqrt(running_var + BN_EPS)       # (L, D)
    scale = w * gamma * inv                         # (L, D)
    shift = beta - running_mean * gamma * inv       # (L, D)

    # --- Lane packing: always present a lane-dense (multiple-of-128) last dim. ---
    feat_pad = 0
    if D % LANES == 0:
        pack = 1
        Dp = D
        x_p = x
    elif LANES % D == 0:
        pack = LANES // D
        row_pad = (-N) % pack                       # <= pack - 1 rows, essentially free
        if row_pad:
            x = jnp.pad(x, ((0, row_pad), (0, 0)))
        Dp = LANES
        x_p = x.reshape((N + row_pad) // pack, Dp)
        scale = jnp.tile(scale, (1, pack))          # params are per-feature -> repeat pack x
        shift = jnp.tile(shift, (1, pack))
    else:
        # Ragged feature dim: pad features to the next multiple of 128 with
        # identity params (scale=1, shift=0); padded cols are sliced off after.
        pack = 1
        Dp = _round_up(D, LANES)
        feat_pad = Dp - D
        x_p = jnp.pad(x, ((0, 0), (0, feat_pad)))
        scale = jnp.pad(scale, ((0, 0), (0, feat_pad)), constant_values=1.0)
        shift = jnp.pad(shift, ((0, 0), (0, feat_pad)))

    Np = x_p.shape[0]

    # --- Row tiling: no wrapper padding; ragged last block handled by Pallas. ---
    if Np <= 8:
        tile = Np                                   # block == full array extent
    else:
        # Cap tile so the grid has >= 2 steps (both v7x TensorCores get work),
        # keep it a multiple of 8 (sublane alignment), and <= tile_rows.
        tile = min(tile_rows, _round_up(pl.cdiv(Np, 2), 8))
        tile = max(tile, 8)
    grid = (pl.cdiv(Np, tile),)

    param_spec = pl.BlockSpec((L, Dp), lambda i: (0, 0))   # constant block -> stays resident

    kernel = functools.partial(_att_learner_kernel, num_layers=L)
    out_p = pl.pallas_call(
        kernel,
        out_shape=jax.ShapeDtypeStruct((Np, Dp), x.dtype),
        grid_spec=pl.GridSpec(
            grid=grid,
            in_specs=[
                pl.BlockSpec((tile, Dp), lambda i: (i, 0)),  # x tile (lane-dense)
                param_spec,                                   # fused scale
                param_spec,                                   # fused shift
            ],
            out_specs=pl.BlockSpec((tile, Dp), lambda i: (i, 0)),
        ),
        compiler_params=pltpu.CompilerParams(
            dimension_semantics=("parallel",)),
    )(x_p, scale, shift)

    # --- Undo packing / padding (cheap; only slices when padding was applied). ---
    if pack > 1:
        out = out_p.reshape(-1, D)
        if out.shape[0] != N:
            out = out[:N]
        return out
    if feat_pad:
        return out_p[:, :D]
    return out_p


def reference_forward(x, w, gamma, beta, running_mean, running_var):
    """Pure-JAX reference (mirrors the PyTorch eval-mode forward)."""
    L = w.shape[0]
    for i in range(L):
        x = x * w[i]
        x = (x - running_mean[i]) * (gamma[i] * jax.lax.rsqrt(running_var[i] + BN_EPS)) + beta[i]
        if i < L - 1:
            x = jnp.maximum(x, 0.0)
    return x


if __name__ == "__main__":
    # Module hyperparameters (small, consistent with the __init__ signature).
    num_gc_layers = 2
    isize = 32            # feature dim D (Attentive(isize), BatchNorm1d(isize))
    hidden_dim = 32
    drop_ratio = 0.5
    num_nodes = 64

    key = jax.random.PRNGKey(0)
    kx, ke, kw, kg, kb, km, kv = jax.random.split(key, 7)

    # Inputs
    x = jax.random.normal(kx, (num_nodes, isize), dtype=jnp.float32)
    edge_index = jax.random.randint(ke, (2, 128), 0, num_nodes, dtype=jnp.int32)

    # Parameters (shapes dictated by __init__):
    #   Attentive(isize).w  -> (isize,)
    #   BatchNorm1d(isize)  -> gamma/beta/running_mean/running_var: (isize,)
    w = 1.0 + 0.1 * jax.random.normal(kw, (num_gc_layers, isize), dtype=jnp.float32)
    gamma = 1.0 + 0.1 * jax.random.normal(kg, (num_gc_layers, isize), dtype=jnp.float32)
    beta = 0.1 * jax.random.normal(kb, (num_gc_layers, isize), dtype=jnp.float32)
    running_mean = 0.1 * jax.random.normal(km, (num_gc_layers, isize), dtype=jnp.float32)
    running_var = 1.0 + 0.1 * jax.random.uniform(kv, (num_gc_layers, isize), dtype=jnp.float32)

    out = att_learner_forward(x, edge_index, w, gamma, beta, running_mean,
                              running_var, drop_ratio=drop_ratio)
    out = jax.block_until_ready(out)

    ref = reference_forward(x, w, gamma, beta, running_mean, running_var)
    assert out.shape == (num_nodes, isize)
    assert jnp.allclose(out, ref, atol=1e-5, rtol=1e-5), "mismatch vs JAX reference"

    print("KERNEL_OK")
</pallas_src>

<mosaic_0001>
module attributes {stable_mosaic.version = 11 : i64} {
  func.func @_att_learner_kernel(%arg0: i32, %arg1: memref<8x128xf32, #tpu.memory_space<vmem>>, %arg2: memref<2x128xf32, #tpu.memory_space<vmem>>, %arg3: memref<2x128xf32, #tpu.memory_space<vmem>>, %arg4: memref<8x128xf32, #tpu.memory_space<vmem>>) attributes {dimension_semantics = [#tpu.dimension_semantics<parallel>], iteration_bounds = array<i64: 2>, scalar_prefetch = 0 : i64, scratch_operands = 0 : i64, tpu.core_type = #tpu.core_type<tc>, window_params = [{transform_indices = @transform_0, window_bounds = array<i64: 8, 128>}, {pipeline_mode = #tpu.pipeline_mode<synchronous>, transform_indices = @transform_1, window_bounds = array<i64: 2, 128>}, {pipeline_mode = #tpu.pipeline_mode<synchronous>, transform_indices = @transform_2, window_bounds = array<i64: 2, 128>}, {transform_indices = @transform_3, window_bounds = array<i64: 8, 128>}]} {
    %c0 = arith.constant 0 : index
    %c0_0 = arith.constant 0 : index
    %0 = vector.load %arg1[%c0, %c0_0] : memref<8x128xf32, #tpu.memory_space<vmem>>, vector<8x128xf32>
    %c0_1 = arith.constant 0 : index
    %c0_2 = arith.constant 0 : index
    %1 = vector.load %arg2[%c0_1, %c0_2] : memref<2x128xf32, #tpu.memory_space<vmem>>, vector<1x128xf32>
    %2 = vector.shape_cast %1 : vector<1x128xf32> to vector<128xf32>
    %3 = vector.shape_cast %2 : vector<128xf32> to vector<1x128xf32>
    %4 = vector.broadcast %3 : vector<1x128xf32> to vector<8x128xf32>
    %5 = arith.mulf %0, %4 : vector<8x128xf32>
    %c0_3 = arith.constant 0 : index
    %c0_4 = arith.constant 0 : index
    %6 = vector.load %arg3[%c0_3, %c0_4] : memref<2x128xf32, #tpu.memory_space<vmem>>, vector<1x128xf32>
    %7 = vector.shape_cast %6 : vector<1x128xf32> to vector<128xf32>
    %8 = vector.shape_cast %7 : vector<128xf32> to vector<1x128xf32>
    %9 = vector.broadcast %8 : vector<1x128xf32> to vector<8x128xf32>
    %10 = arith.addf %5, %9 : vector<8x128xf32>
    %cst = arith.constant 0.000000e+00 : f32
    %11 = vector.broadcast %cst : f32 to vector<8x128xf32>
    %12 = arith.maximumf %10, %11 : vector<8x128xf32>
    %c1 = arith.constant 1 : index
    %c0_5 = arith.constant 0 : index
    %13 = vector.load %arg2[%c1, %c0_5] : memref<2x128xf32, #tpu.memory_space<vmem>>, vector<1x128xf32>
    %14 = vector.shape_cast %13 : vector<1x128xf32> to vector<128xf32>
    %15 = vector.shape_cast %14 : vector<128xf32> to vector<1x128xf32>
    %16 = vector.broadcast %15 : vector<1x128xf32> to vector<8x128xf32>
    %17 = arith.mulf %12, %16 : vector<8x128xf32>
    %c1_6 = arith.constant 1 : index
    %c0_7 = arith.constant 0 : index
    %18 = vector.load %arg3[%c1_6, %c0_7] : memref<2x128xf32, #tpu.memory_space<vmem>>, vector<1x128xf32>
    %19 = vector.shape_cast %18 : vector<1x128xf32> to vector<128xf32>
    %20 = vector.shape_cast %19 : vector<128xf32> to vector<1x128xf32>
    %21 = vector.broadcast %20 : vector<1x128xf32> to vector<8x128xf32>
    %22 = arith.addf %17, %21 : vector<8x128xf32>
    %c0_8 = arith.constant 0 : index
    %c0_9 = arith.constant 0 : index
    %23 = vector.load %arg4[%c0_8, %c0_9] : memref<8x128xf32, #tpu.memory_space<vmem>>, vector<8x128xf32>
    tpu.vector_store %arg4[%c0_8, %c0_9], %22 {strides = array<i32>} : memref<8x128xf32, #tpu.memory_space<vmem>>, vector<8x128xf32>,
    return
  }
  func.func @transform_0(%arg0: i32) -> (i32, i32) {
    %c0_i32 = arith.constant 0 : i32
    %c0_i32_0 = arith.constant 0 : i32
    return %arg0, %c0_i32 : i32, i32
  }
  func.func @transform_1(%arg0: i32) -> (i32, i32) {
    %c0_i32 = arith.constant 0 : i32
    %c0_i32_0 = arith.constant 0 : i32
    %c0_i32_1 = arith.constant 0 : i32
    return %c0_i32, %c0_i32_0 : i32, i32
  }
  func.func @transform_2(%arg0: i32) -> (i32, i32) {
    %c0_i32 = arith.constant 0 : i32
    %c0_i32_0 = arith.constant 0 : i32
    %c0_i32_1 = arith.constant 0 : i32
    return %c0_i32, %c0_i32_0 : i32, i32
  }
  func.func @transform_3(%arg0: i32) -> (i32, i32) {
    %c0_i32 = arith.constant 0 : i32
    %c0_i32_0 = arith.constant 0 : i32
    return %arg0, %c0_i32 : i32, i32
  }
}

</mosaic_0001>

<bundles_post_ra>
// kernel: tpu_custom_call.1
= control target key start
LH: loop header
LB: loop body
LE: loop exit
PB: predicated region body
PF: predicated region fallthrough
CT: control target
= control target key end

     0   :  { %8 = vsyncpa [#allocation3], 0  ;;  %s714_s0 = inlined_call_operand.hbm [shape: f32[16,128], index: 0, kind: input, shape index: {}]   ;;  %s715_s1 = inlined_call_operand.hbm [shape: f32[2,128], index: 1, kind: input, shape index: {}]   ;;  %s716_s2 = inlined_call_operand.vmem [shape: f32[2,128], index: 2, kind: input, shape index: {}]   ;;  %s717_s3 = inlined_call_operand.hbm [shape: f32[16,128], index: 3, kind: output, shape index: {}]  }
   0x1   :  { %10 = vsyncpa [#allocation3 + $0x1], 0 }
   0x2   :  { %11 = vsyncpa [#allocation6], 0 }
   0x3   :  { %12 = vsyncpa [#allocation4], 0 }
   0x4   :  { %14 = vsyncpa [#allocation4 + $0x1], 0  ;;  %s542_s12 = smov 0   ;;  %s544_s13 = smov 0  }
   0x5   :  { %s546_s14 = smov 0   ;;  %s548_s15 = smov 0  }
   0x6 LB: > { %s563_s16 = sadd.s32 4294967295, %s517_s15   ;;  %s320_s17 = sadd.s32 4294967294, %s517_s15   ;;  %s517_s15 = sphi %s548_s15, %s740_s15   ;;  %s513_s14 = sphi %s546_s14, %s739_s14   ;;  %s509_s13 = sphi %s544_s13, %s738_s13   ;;  %s505_s12 = sphi %s542_s12, %s737_s12  }
   0x7   : > { %p40_p0 = scmp.ne.s32.totalorder %s509_s13, %s505_s12  ;;  %p718_p1 = scmp.eq.s32.totalorder %s563_s16, 0 }
   0x8   : > { %p112_p3 = scmp.eq.s32.totalorder %s320_s17, 1  ;;  %p321_p5 = scmp.ge.s32.totalorder %s517_s15, 1 }
   0x9   : > { %p572_p4 = por %p718_p1, %p40_p0  ;;  %p119_p7 = scmp.lt.s32.totalorder %s517_s15, 3 }
   0xa   : > { %p577_p6 = por %p112_p3, %p40_p0  ;;  %s519_s21 = smov [#allocation5]  }
   0xb   : > { %s722_s18 = scalar_select %p572_p4, 1, 0 }
   0xc   : > { %s723_s19 = scalar_select %p577_p6, 1, 0 }
   0xd   : > { %p582_p8 = pnand %p321_p5, %p119_p7  ;;  %s132_s22 = sshll.u32 %s519_s21, 4  ;;  %s133_s22 = int_to_ptr.vmem [resolvable:$true] %s132_s22 }
   0xe   : > { %s590_s23 = sadd.s32 1, %s517_s15   ;;  %s27_s27 = sadd.s32 1, %s513_s14 }
   0xf   : > { %s724_s20 = scalar_select %p582_p8, 1, 0 }
  0x10   : > { %p346_p10 = pneg %p582_p8  ;;  %s24_s25 = ssub.s32 %s517_s15, %s590_s23 }
  0x11   : > { %p600_p12 = scmp.eq.s32.totalorder %s24_s25, 0  ;;  %p34_p13 = scmp.ne.s32.totalorder %s513_s14, %s509_s13 }
  0x12   : > { %p594_p11 = pnand %p346_p10, %p718_p1  ;;  %s406_s28 = scalar_lea.vmem %s133_s22, 32 }
  0x13   : > { %p407_p3 = scmp.ne.s32.totalorder %s133_s22, %s406_s28  ;;  %p414_p9 = scmp.lt.s32.totalorder %s133_s22, %s133_s22 }
  0x14   : > { %p397_p0 = pneg %p594_p11  ;;  %p415_p2 = scmp.lt.s32.totalorder %s406_s28, %s406_s28 }
  0x16   : > { %p409_p5 = pnand %p407_p3, %p397_p0  ;;  %p416_p10 = por %p415_p2, %p414_p9 }
  0x18   : > { %p410_p7 = pneg %p409_p5 }
  0x1a   : > { %p417_p1 = pnand %p416_p10, %p410_p7 }
  0x1c   : > { %420 = shalt.err (!%p417_p1)
}
  0x1d   : > { %349 = dma.hbm_to_vmem [thread:$0]  (!%p594_p11), %s715_s1, 32, %s133_s22, [#allocation6]  }
  0x1e   : > { %s617_s4 = scalar_select %p600_p12, %s513_s14, %s27_s27  }
  0x1f   : > { %p35_p1 = scmp.eq.s32.totalorder %s517_s15, 0  ;;  %p727_p2 = scmp.eq.s32.totalorder %s563_s16, 1 }
  0x20   : > { %p359_p0 = scmp.lt.s32.totalorder %s517_s15, 2  ;;  %s146_s6 = sand.u32 1, %s513_s14  }
  0x21   : > { %p625_p9 = por %p727_p2, %p34_p13  ;;  %p36_p3 = por %p35_p1, %p34_p13 }
  0x22   : > { %s324_s7 = sshll.u32 %s146_s6, 3  ;;  %s325_s8 = sshll.u32 %s517_s15, 7 }
  0x23   : > { %s728_s5 = scalar_select %p625_p9, 1, 0 }
  0x24   : > { %s638_s11 = scalar_lea.hbm %s714_s0, %s325_s8  ;;  %s150_s17 = scalar_lea.vmem [#allocation2], %s324_s7 }
  0x25   : > { %s157_s21 = sshll.u32 %s150_s17, 4  ;;  %p640_p11 = pnand %p359_p0, %p36_p3  ;;  %s158_s21 = int_to_ptr.vmem [resolvable:$true] %s157_s21 }
  0x26   : > { %s147_s24 = scalar_lea.sflag [#allocation3], %s146_s6  ;;  %s421_s25 = scalar_lea.hbm %s638_s11, 128 }
  0x27   : > { %p422_p12 = scmp.ne.s32.totalorder %s638_s11, %s421_s25  ;;  %p423_p13 = pneg %p640_p11 }
  0x28   : > { %s426_s28 = scalar_lea.hbm %s714_s0, 256  ;;  %p427_p10 = scmp.lt.s32.totalorder %s638_s11, %s714_s0 }
  0x29   : > { %p424_p5 = pnand %p423_p13, %p422_p12  ;;  %p428_p1 = scmp.lt.s32.totalorder %s426_s28, %s421_s25 }
  0x2b   : > { %p425_p7 = pneg %p424_p5  ;;  %p429_p2 = por %p428_p1, %p427_p10 }
  0x2d   : > { %p430_p0 = pnand %p429_p2, %p425_p7 }
  0x2f   : > { %433 = shalt.err (!%p430_p0)
}
  0x30   : > { %s434_s7 = scalar_lea.vmem %s158_s21, 128  ;;  %s520_s6 = smov [#allocation2]  }
  0x31   : > { %p435_p3 = scmp.ne.s32.totalorder %s158_s21, %s434_s7  ;;  %s439_s8 = sshll.u32 %s520_s6, 4  ;;  %s440_s8 = int_to_ptr.vmem [resolvable:$false] %s439_s8 }
  0x32   : > { %s441_s9 = scalar_lea.vmem %s440_s8, 256  ;;  %p442_p12 = scmp.lt.s32.totalorder %s158_s21, %s440_s8 }
  0x33   : > { %p437_p6 = pnand %p435_p3, %p423_p13  ;;  %p443_p5 = scmp.lt.s32.totalorder %s441_s9, %s434_s7 }
  0x35   : > { %p438_p9 = pneg %p437_p6  ;;  %p444_p4 = por %p443_p5, %p442_p12 }
  0x37   : > { %p445_p8 = pnand %p444_p4, %p438_p9 }
  0x39   : > { %448 = shalt.err (!%p445_p8)
}
  0x3a   : > { %353 = dma.hbm_to_vmem [thread:$0]  (!%p640_p11), %s638_s11, 128, %s158_s21, %s147_s24  }
  0x3b   : > { %p730_p7 = scmp.ne.s32.totalorder %s724_s20, 0 }
  0x3c   : > { %s661_s10 = sand.u32 (!%p730_p7), 1, %s509_s13   ;;  %p731_p6 = scmp.ne.s32.totalorder (!%p730_p7), %s722_s18, 0 }
  0x3d   : > { %166 = sbr.rel (%p730_p7) target bundleno = 96 (0x60), region = 32  ;;  %s327_s17 = sshll.u32 (!%p730_p7), %s661_s10, 3 }
  0x3e   : > { %s169_s25 = scalar_lea.sflag (!%p730_p7), [#allocation3], %s661_s10  ;;  %s172_s26 = scalar_lea.vmem (!%p730_p7), [#allocation2], %s327_s17 }
  0x42   : > { %492 = dma.done.wait (%p731_p6), %s169_s25, 128  }
  0x43   : > { %494 = vsyncadd (%p731_p6), %s169_s25, 4294967168  ;;  %p732_p4 = scmp.eq.s32.totalorder %s563_s16, 0 }
  0x45   : > { %496 = dma.done.wait (%p732_p4), [#allocation6], 32   ;;  %p733_p8 = pmov %p732_p4 }
  0x46   : > { %v199_v0 = vld [vmem:[%s172_s26] sm:$0xff]  ;;  %v330_v1 = vld [vmem:[#allocation5] ss:$0 sm:$0xff]  ;;  %v332_v5 = vld [vmem:[#allocation5 + $0x1] ss:$0 sm:$0xff]  ;;  %s198_s22 = scalar_lea.vmem [#allocation7], %s327_s17 }
  0x47   : > { %498 = vsyncadd (%p733_p8), [#allocation6], 4294967264  ;;  %v331_v2 = vld [vmem:[%s716_s2] ss:$0 sm:$0xff]  ;;  %v205_v3 = vmul.f32 %v330_v1, %v199_v0  ;;  %v333_v7 = vld [vmem:[%s716_s2 + $0x1] ss:$0 sm:$0xff] }
  0x48   : > { %s240_s24 = sshll.u32 %s198_s22, 4  ;;  %s335_s27 = sshll.u32 %s563_s16, 7  ;;  %s241_s24 = int_to_ptr.vmem [resolvable:$true] %s240_s24 }
  0x49   : > { %v211_v4 = vadd.f32 %v331_v2, %v205_v3  ;;  %s238_s30 = scalar_lea.hbm %s717_s3, %s335_s27  ;;  %s227_s7 = scalar_lea.sflag [#allocation4], %s661_s10 }
  0x4a   : > { %s449_s6 = scalar_lea.vmem %s241_s24, 128  ;;  %p734_p11 = scmp.ne.s32.totalorder %s728_s5, 0 }
  0x4b   : > { %v212_v6 = vmax.f32 %v211_v4, 0.0  ;;  %p450_p9 = scmp.ne.s32.totalorder %s241_s24, %s449_s6  ;;  %s521_s8 = smov [#allocation7]  }
  0x4c   : > { %s453_s9 = sshll.u32 %s521_s8, 4  ;;  %s454_s9 = int_to_ptr.vmem [resolvable:$false] %s453_s9 }
  0x4d   : > { %v218_v8 = vmul.f32 %v332_v5, %v212_v6  ;;  %p451_p13 = pnand %p450_p9, %p734_p11  ;;  %s455_s17 = scalar_lea.vmem %s454_s9, 256 }
  0x4e   : > { %p456_p1 = scmp.lt.s32.totalorder %s241_s24, %s454_s9  ;;  %p457_p2 = scmp.lt.s32.totalorder %s455_s17, %s449_s6 }
  0x4f   : > { %v224_v9 = vadd.f32 %v333_v7, %v218_v8  ;;  %p452_p10 = pneg %p451_p13 }
  0x50   : > { %p458_p0 = por %p457_p2, %p456_p1 }
  0x51   : > { %225 = vst [vmem:[%s198_s22] sm:$0xff] %v224_v9 }
  0x52   : > { %p459_p3 = pnand %p458_p0, %p452_p10 }
  0x54   : > { %462 = shalt.err (!%p459_p3)
}
  0x55   : > { %s463_s16 = scalar_lea.hbm %s238_s30, 128  ;;  %s467_s26 = scalar_lea.hbm %s717_s3, 256 }
  0x56   : > { %p464_p12 = scmp.ne.s32.totalorder %s238_s30, %s463_s16  ;;  %p468_p6 = scmp.lt.s32.totalorder %s238_s30, %s717_s3 }
  0x57   : > { %p469_p4 = scmp.lt.s32.totalorder %s467_s26, %s463_s16 }
  0x58   : > { %p465_p5 = pnand %p464_p12, %p734_p11 }
  0x59   : > { %p470_p8 = por %p469_p4, %p468_p6 }
  0x5a   : > { %p466_p7 = pneg %p465_p5 }
  0x5c   : > { %p471_p9 = pnand %p470_p8, %p466_p7 }
  0x5e   : > { %474 = shalt.err (!%p471_p9)
}
  0x5f   : > { %344 = dma.vmem_to_hbm [thread:$0]  (%p734_p11), %s241_s24, 128, %s238_s30, %s227_s7  }
  0x60 PF: > { %s252_s18 = sand.u32 1, %s505_s12   ;;  %p735_p13 = scmp.ne.s32.totalorder %s723_s19, 0 }
  0x61   : > { %p736_p10 = scmp.ge.s32.totalorder %s517_s15, 2  ;;  %s253_s21 = scalar_lea.sflag [#allocation4], %s252_s18 }
  0x63   : > { %p355_p1 = pnand %p736_p10, %p735_p13 }
  0x65   : > { %p356_p2 = pneg %p355_p1 }
  0x67   : > { %500 = dma.done.wait (%p356_p2), %s253_s21, 128  }
  0x68   : > { %502 = vsyncadd (%p356_p2), %s253_s21, 4294967168  ;;  %p17_p0 = scmp.ge.s32.totalorder %s590_s23, 4   ;;  %s737_s12 = smov %s509_s13 }
  0x69   : > { %s738_s13 = smov %s513_s14  ;;  %s739_s14 = smov %s617_s4 }
  0x6a   : > { %s740_s15 = smov %s590_s23  ;;  %19 = sbr.rel (!%p17_p0) target bundleno = 6 (0x6), region = 81 }
  0x6f   :  { %258 = vsyncpa [#allocation3], 1 }
  0x70   :  { %260 = vsyncpa [#allocation3 + $0x1], 1 }
  0x71   :  { %261 = vsyncpa [#allocation6], 1 }
  0x72   :  { %262 = vsyncpa [#allocation4], 1 }
  0x73   :  { %264 = vsyncpa [#allocation4 + $0x1], 1 }

</bundles_post_ra>
